<compile_context>
chip_gen: v6e
topology: v6e:2x2x1
jax: 0.10.0
libtpu: 0.0.40
codegen_flags: <defaults>
</compile_context>

<pallas_src>
import functools

import numpy as np
import jax
import jax.numpy as jnp
from jax.experimental import pallas as pl
from jax.experimental.pallas import tpu as pltpu

_LANE = 128


# --------------------------------------------------------------------------
# Crop geometry (matches torchvision F.ten_crop: tl, tr, bl, br, center,
# then the same five positions of the horizontally flipped image).
# --------------------------------------------------------------------------
def _crop_positions(H, W, ch, cw):
    ct = int(round((H - ch) / 2.0))
    cl = int(round((W - cw) / 2.0))
    return ((0, 0), (0, W - cw), (H - ch, 0), (H - ch, W - cw), (ct, cl))


# --------------------------------------------------------------------------
# Kernels
# --------------------------------------------------------------------------
def _ten_crop_kernel_rev(x_ref, o_ref, *, positions, ch, cw):
    # x_ref : VMEM (1, nb, H, W)       one block of flattened frames
    # o_ref : VMEM (1, 10, nb, ch, cw) all ten crops of those frames
    x = x_ref[0]                       # (nb, H, W)
    xr = x[..., ::-1]                  # ONE hoisted full-slab lane reversal
    for k, (top, left) in enumerate(positions):
        o_ref[0, k] = x[:, top:top + ch, left:left + cw]
        o_ref[0, 5 + k] = xr[:, top:top + ch, left:left + cw]
    # TODO(synk): for uint8/bf16 frames, if a bundle dump ever shows the
    # slice/repack path binding before the output DMA, widen the copy path
    # to 32-bit containers with pltpu.bitcast.


def _ten_crop_kernel_preflip(x_ref, xflip_ref, o_ref, *, positions, ch, cw):
    # Fallback: second operand is the already h-flipped input; all ten crops
    # are plain static slices.
    x = x_ref[0]
    xr = xflip_ref[0]
    for k, (top, left) in enumerate(positions):
        o_ref[0, k] = x[:, top:top + ch, left:left + cw]
        o_ref[0, 5 + k] = xr[:, top:top + ch, left:left + cw]


# --------------------------------------------------------------------------
# Capability probe: does the *production* pattern (full-slab reverse, then an
# unaligned static slice) lower on this jax build / dtype / shape?
# --------------------------------------------------------------------------
@functools.lru_cache(maxsize=None)
def _lane_reverse_supported(H, W, ch, cw, top, left, dtype_str):
    dtype = jnp.dtype(dtype_str)

    def k(x_ref, o_ref):
        xr = x_ref[...][..., ::-1]
        o_ref[...] = xr[:, top:top + ch, left:left + cw]

    try:
        spec_in = jax.ShapeDtypeStruct((2, H, W), dtype)
        spec_out = jax.ShapeDtypeStruct((2, ch, cw), dtype)
        jax.jit(pl.pallas_call(k, out_shape=spec_out)).lower(spec_in).compile()
        return True
    except Exception:
        return False


# --------------------------------------------------------------------------
# VMEM sizing (generation-aware, tile padding + double buffering accounted)
# --------------------------------------------------------------------------
def _sublane(itemsize):
    return {1: 32, 2: 16, 4: 8, 8: 8}.get(int(itemsize), 8)


def _round_up(x, m):
    return ((x + m - 1) // m) * m


def _vmem_budget():
    physical = 64 * 1024 * 1024            # conservative default (v7x-sized)
    try:
        info = pltpu.get_tpu_info()
        cap = int(getattr(info, "vmem_capacity_bytes", 0) or 0)
        if cap > 0:
            physical = cap
    except Exception:
        pass
    vmem_limit = (physical * 3) // 4        # ~96 MiB v5e/v6e, ~48 MiB v7x
    block_budget = max(vmem_limit - 8 * 1024 * 1024, 4 * 1024 * 1024)
    return int(vmem_limit), int(block_budget)


def _step_vmem_bytes(nb, H, W, ch, cw, itemsize, preflip):
    sub = _sublane(itemsize)
    in_block = nb * _round_up(H, sub) * _round_up(W, _LANE) * itemsize
    out_block = 10 * nb * _round_up(ch, sub) * _round_up(cw, _LANE) * itemsize
    n_in = 2 if preflip else 1
    # local copy of the slab (+ the hoisted reversed slab on the rev path)
    local = in_block + (0 if preflip else in_block)
    return 2 * n_in * in_block + 2 * out_block + local


def _pick_nb(TC, B_outer, H, W, ch, cw, itemsize, preflip, block_budget):
    nb_max = 1
    for cand in range(1, TC + 1):           # footprint is monotonic in nb
        if _step_vmem_bytes(cand, H, W, ch, cw, itemsize, preflip) <= block_budget:
            nb_max = cand
        else:
            break
    if B_outer == 1 and TC >= 2:
        # keep >= 2 grid steps so v7x's two TensorCores both get work
        nb_max = min(nb_max, -(-TC // 2))
    nb_max = max(nb_max, 1)
    divisors = [d for d in range(1, nb_max + 1) if TC % d == 0]
    nb_div = max(divisors) if divisors else 1
    if 2 * nb_div >= nb_max:
        return nb_div                        # exact tiling, no ragged block
    return nb_max                            # ragged last block (OOB dropped)


# --------------------------------------------------------------------------
# Public op
# --------------------------------------------------------------------------
def ten_crop(x, size):
    """x: (..., T, C, H, W) -> (..., 10, T, C, ch, cw), torchvision order."""
    if isinstance(size, (int, np.integer)):
        ch, cw = int(size), int(size)
    else:
        size = tuple(int(s) for s in size)
        ch, cw = (size[0], size[0]) if len(size) == 1 else (size[0], size[1])
    if x.ndim < 4:
        raise ValueError("ten_crop expects input of shape (..., T, C, H, W)")
    *outer, T, C, H, W = (int(d) for d in x.shape)
    if ch > H or cw > W:
        raise ValueError(f"crop size ({ch}, {cw}) larger than image ({H}, {W})")

    outer = tuple(outer)
    B_outer = int(np.prod(outer)) if outer else 1
    TC = T * C

    positions = _crop_positions(H, W, ch, cw)
    ct, cl = positions[4]
    dtype = jnp.dtype(x.dtype)
    itemsize = dtype.itemsize

    x4 = x.reshape(B_outer, TC, H, W)

    use_rev = _lane_reverse_supported(H, W, ch, cw, ct, cl, str(dtype))
    preflip = not use_rev
    vmem_limit, block_budget = _vmem_budget()
    nb = _pick_nb(TC, B_outer, H, W, ch, cw, itemsize, preflip, block_budget)
    n_tc_blocks = pl.cdiv(TC, nb)

    out_shape = jax.ShapeDtypeStruct((B_outer, 10, TC, ch, cw), dtype)
    x_spec = pl.BlockSpec((1, nb, H, W), lambda b, j: (b, j, 0, 0))
    out_spec = pl.BlockSpec((1, 10, nb, ch, cw), lambda b, j: (b, 0, j, 0, 0))

    n_frames = B_outer * TC
    bytes_accessed = (n_frames * H * W * itemsize * (2 if preflip else 1)
                      + 10 * n_frames * ch * cw * itemsize)
    cost = pl.CostEstimate(flops=0, transcendentals=0,
                           bytes_accessed=int(bytes_accessed))
    cparams = pltpu.CompilerParams(
        dimension_semantics=("parallel", "parallel"),
        vmem_limit_bytes=int(vmem_limit))

    if use_rev:
        kernel = functools.partial(_ten_crop_kernel_rev,
                                   positions=positions, ch=ch, cw=cw)
        out = pl.pallas_call(
            kernel,
            out_shape=out_shape,
            grid=(B_outer, n_tc_blocks),
            in_specs=[x_spec],
            out_specs=out_spec,
            compiler_params=cparams,
            cost_estimate=cost,
        )(x4)
    else:
        # TODO(synk): this fallback costs one extra HBM read+write of the
        # input; drop it once lax.rev lowers in Pallas TPU everywhere.
        xflip = jnp.flip(x4, axis=-1)
        kernel = functools.partial(_ten_crop_kernel_preflip,
                                   positions=positions, ch=ch, cw=cw)
        out = pl.pallas_call(
            kernel,
            out_shape=out_shape,
            grid=(B_outer, n_tc_blocks),
            in_specs=[x_spec, x_spec],
            out_specs=out_spec,
            compiler_params=cparams,
            cost_estimate=cost,
        )(x4, xflip)

    # Free (contiguous) reshape to the final layout.
    return out.reshape(*outer, 10, T, C, ch, cw)


def ten_crop_module(result, size):
    """Mirrors TenCrop.forward on a dict (unspecified keys preserved)."""
    clips = ten_crop(result["inputs"], size)
    out = dict(result)
    meta = dict(out.get("meta", {}))
    meta["frame_shape"] = tuple(int(d) for d in clips.shape[-2:])
    meta["num_crops"] = 10
    out["inputs"] = clips
    out["meta"] = meta
    return out


# --------------------------------------------------------------------------
# Pure-JAX reference (torchvision F.ten_crop + stack(dim=-5))
# --------------------------------------------------------------------------
def _ref_ten_crop(x, ch, cw):
    H, W = x.shape[-2:]
    ct = int(round((H - ch) / 2.0))
    cl = int(round((W - cw) / 2.0))

    def crop(im, t, l):
        return im[..., t:t + ch, l:l + cw]

    def five(im):
        return [crop(im, 0, 0), crop(im, 0, W - cw), crop(im, H - ch, 0),
                crop(im, H - ch, W - cw), crop(im, ct, cl)]

    crops = five(x) + five(x[..., ::-1])
    return jnp.stack(crops, axis=-5)


if __name__ == "__main__":
    key = jax.random.PRNGKey(0)
    k1, k2, k3 = jax.random.split(key, 3)

    # Test 1: outer batch dim, aligned crop, float32.
    B, T, C, H, W = 2, 3, 4, 16, 16
    size = 8
    x = jax.random.normal(k1, (B, T, C, H, W), dtype=jnp.float32)
    res = ten_crop_module({"inputs": x, "meta": {}}, size)
    clips = jax.block_until_ready(res["inputs"])
    assert clips.shape == (B, 10, T, C, size, size), clips.shape
    assert res["meta"]["frame_shape"] == (size, size)
    assert res["meta"]["num_crops"] == 10
    assert bool(jnp.array_equal(clips, _ref_ten_crop(x, size, size)))

    # Test 2: no outer dims, lane/sublane-unaligned crop offsets, bfloat16.
    x2 = jax.random.normal(k2, (5, 3, 20, 20), dtype=jnp.bfloat16)
    clips2 = jax.block_until_ready(ten_crop(x2, 12))
    assert clips2.shape == (10, 5, 3, 12, 12), clips2.shape
    assert bool(jnp.array_equal(clips2, _ref_ten_crop(x2, 12, 12)))

    # Test 3: T*C prime -> exercises the ragged-last-block path + rect crop.
    x3 = jax.random.normal(k3, (7, 1, 16, 16), dtype=jnp.float32)
    clips3 = jax.block_until_ready(ten_crop(x3, (8, 12)))
    assert clips3.shape == (10, 7, 1, 8, 12), clips3.shape
    assert bool(jnp.array_equal(clips3, _ref_ten_crop(x3, 8, 12)))

    print("KERNEL_OK")
</pallas_src>

<mosaic_0001>
module attributes {stable_mosaic.version = 11 : i64} {
  func.func @_ten_crop_kernel_preflip(%arg0: i32, %arg1: i32, %arg2: memref<1x12x16x16xf32, #tpu.memory_space<vmem>>, %arg3: memref<1x12x16x16xf32, #tpu.memory_space<vmem>>, %arg4: memref<1x10x12x8x8xf32, #tpu.memory_space<vmem>>) attributes {dimension_semantics = [#tpu.dimension_semantics<parallel>, #tpu.dimension_semantics<parallel>], iteration_bounds = array<i64: 2, 1>, scalar_prefetch = 0 : i64, scratch_operands = 0 : i64, tpu.core_type = #tpu.core_type<tc>, window_params = [{transform_indices = @transform_0, window_bounds = array<i64: 1, 12, 16, 16>}, {transform_indices = @transform_1, window_bounds = array<i64: 1, 12, 16, 16>}, {transform_indices = @transform_2, window_bounds = array<i64: 1, 10, 12, 8, 8>}]} {
    %c0 = arith.constant 0 : index
    %c0_0 = arith.constant 0 : index
    %c0_1 = arith.constant 0 : index
    %c0_2 = arith.constant 0 : index
    %0 = vector.load %arg2[%c0, %c0_0, %c0_1, %c0_2] : memref<1x12x16x16xf32, #tpu.memory_space<vmem>>, vector<1x12x16x16xf32>
    %1 = vector.shape_cast %0 : vector<1x12x16x16xf32> to vector<12x16x16xf32>
    %c0_3 = arith.constant 0 : index
    %c0_4 = arith.constant 0 : index
    %c0_5 = arith.constant 0 : index
    %c0_6 = arith.constant 0 : index
    %2 = vector.load %arg3[%c0_3, %c0_4, %c0_5, %c0_6] : memref<1x12x16x16xf32, #tpu.memory_space<vmem>>, vector<1x12x16x16xf32>
    %3 = vector.shape_cast %2 : vector<1x12x16x16xf32> to vector<12x16x16xf32>
    %4 = vector.extract_strided_slice %1 {offsets = [0, 0, 0], sizes = [12, 8, 8], strides = [1, 1, 1]} : vector<12x16x16xf32> to vector<12x8x8xf32>
    %c0_7 = arith.constant 0 : index
    %c0_8 = arith.constant 0 : index
    %c0_9 = arith.constant 0 : index
    %c0_10 = arith.constant 0 : index
    %c0_11 = arith.constant 0 : index
    %5 = vector.load %arg4[%c0_7, %c0_8, %c0_9, %c0_10, %c0_11] : memref<1x10x12x8x8xf32, #tpu.memory_space<vmem>>, vector<1x1x12x8x8xf32>
    %6 = vector.shape_cast %5 : vector<1x1x12x8x8xf32> to vector<12x8x8xf32>
    %7 = vector.shape_cast %4 : vector<12x8x8xf32> to vector<1x1x12x8x8xf32>
    tpu.vector_store %arg4[%c0_7, %c0_8, %c0_9, %c0_10, %c0_11], %7 {strides = array<i32>} : memref<1x10x12x8x8xf32, #tpu.memory_space<vmem>>, vector<1x1x12x8x8xf32>,
    %8 = vector.extract_strided_slice %3 {offsets = [0, 0, 0], sizes = [12, 8, 8], strides = [1, 1, 1]} : vector<12x16x16xf32> to vector<12x8x8xf32>
    %c0_12 = arith.constant 0 : index
    %c5 = arith.constant 5 : index
    %c0_13 = arith.constant 0 : index
    %c0_14 = arith.constant 0 : index
    %c0_15 = arith.constant 0 : index
    %9 = vector.load %arg4[%c0_12, %c5, %c0_13, %c0_14, %c0_15] : memref<1x10x12x8x8xf32, #tpu.memory_space<vmem>>, vector<1x1x12x8x8xf32>
    %10 = vector.shape_cast %9 : vector<1x1x12x8x8xf32> to vector<12x8x8xf32>
    %11 = vector.shape_cast %8 : vector<12x8x8xf32> to vector<1x1x12x8x8xf32>
    tpu.vector_store %arg4[%c0_12, %c5, %c0_13, %c0_14, %c0_15], %11 {strides = array<i32>} : memref<1x10x12x8x8xf32, #tpu.memory_space<vmem>>, vector<1x1x12x8x8xf32>,
    %12 = vector.extract_strided_slice %1 {offsets = [0, 0, 8], sizes = [12, 8, 8], strides = [1, 1, 1]} : vector<12x16x16xf32> to vector<12x8x8xf32>
    %c0_16 = arith.constant 0 : index
    %c1 = arith.constant 1 : index
    %c0_17 = arith.constant 0 : index
    %c0_18 = arith.constant 0 : index
    %c0_19 = arith.constant 0 : index
    %13 = vector.load %arg4[%c0_16, %c1, %c0_17, %c0_18, %c0_19] : memref<1x10x12x8x8xf32, #tpu.memory_space<vmem>>, vector<1x1x12x8x8xf32>
    %14 = vector.shape_cast %13 : vector<1x1x12x8x8xf32> to vector<12x8x8xf32>
    %15 = vector.shape_cast %12 : vector<12x8x8xf32> to vector<1x1x12x8x8xf32>
    tpu.vector_store %arg4[%c0_16, %c1, %c0_17, %c0_18, %c0_19], %15 {strides = array<i32>} : memref<1x10x12x8x8xf32, #tpu.memory_space<vmem>>, vector<1x1x12x8x8xf32>,
    %16 = vector.extract_strided_slice %3 {offsets = [0, 0, 8], sizes = [12, 8, 8], strides = [1, 1, 1]} : vector<12x16x16xf32> to vector<12x8x8xf32>
    %c0_20 = arith.constant 0 : index
    %c6 = arith.constant 6 : index
    %c0_21 = arith.constant 0 : index
    %c0_22 = arith.constant 0 : index
    %c0_23 = arith.constant 0 : index
    %17 = vector.load %arg4[%c0_20, %c6, %c0_21, %c0_22, %c0_23] : memref<1x10x12x8x8xf32, #tpu.memory_space<vmem>>, vector<1x1x12x8x8xf32>
    %18 = vector.shape_cast %17 : vector<1x1x12x8x8xf32> to vector<12x8x8xf32>
    %19 = vector.shape_cast %16 : vector<12x8x8xf32> to vector<1x1x12x8x8xf32>
    tpu.vector_store %arg4[%c0_20, %c6, %c0_21, %c0_22, %c0_23], %19 {strides = array<i32>} : memref<1x10x12x8x8xf32, #tpu.memory_space<vmem>>, vector<1x1x12x8x8xf32>,
    %20 = vector.extract_strided_slice %1 {offsets = [0, 8, 0], sizes = [12, 8, 8], strides = [1, 1, 1]} : vector<12x16x16xf32> to vector<12x8x8xf32>
    %c0_24 = arith.constant 0 : index
    %c2 = arith.constant 2 : index
    %c0_25 = arith.constant 0 : index
    %c0_26 = arith.constant 0 : index
    %c0_27 = arith.constant 0 : index
    %21 = vector.load %arg4[%c0_24, %c2, %c0_25, %c0_26, %c0_27] : memref<1x10x12x8x8xf32, #tpu.memory_space<vmem>>, vector<1x1x12x8x8xf32>
    %22 = vector.shape_cast %21 : vector<1x1x12x8x8xf32> to vector<12x8x8xf32>
    %23 = vector.shape_cast %20 : vector<12x8x8xf32> to vector<1x1x12x8x8xf32>
    tpu.vector_store %arg4[%c0_24, %c2, %c0_25, %c0_26, %c0_27], %23 {strides = array<i32>} : memref<1x10x12x8x8xf32, #tpu.memory_space<vmem>>, vector<1x1x12x8x8xf32>,
    %24 = vector.extract_strided_slice %3 {offsets = [0, 8, 0], sizes = [12, 8, 8], strides = [1, 1, 1]} : vector<12x16x16xf32> to vector<12x8x8xf32>
    %c0_28 = arith.constant 0 : index
    %c7 = arith.constant 7 : index
    %c0_29 = arith.constant 0 : index
    %c0_30 = arith.constant 0 : index
    %c0_31 = arith.constant 0 : index
    %25 = vector.load %arg4[%c0_28, %c7, %c0_29, %c0_30, %c0_31] : memref<1x10x12x8x8xf32, #tpu.memory_space<vmem>>, vector<1x1x12x8x8xf32>
    %26 = vector.shape_cast %25 : vector<1x1x12x8x8xf32> to vector<12x8x8xf32>
    %27 = vector.shape_cast %24 : vector<12x8x8xf32> to vector<1x1x12x8x8xf32>
    tpu.vector_store %arg4[%c0_28, %c7, %c0_29, %c0_30, %c0_31], %27 {strides = array<i32>} : memref<1x10x12x8x8xf32, #tpu.memory_space<vmem>>, vector<1x1x12x8x8xf32>,
    %28 = vector.extract_strided_slice %1 {offsets = [0, 8, 8], sizes = [12, 8, 8], strides = [1, 1, 1]} : vector<12x16x16xf32> to vector<12x8x8xf32>
    %c0_32 = arith.constant 0 : index
    %c3 = arith.constant 3 : index
    %c0_33 = arith.constant 0 : index
    %c0_34 = arith.constant 0 : index
    %c0_35 = arith.constant 0 : index
    %29 = vector.load %arg4[%c0_32, %c3, %c0_33, %c0_34, %c0_35] : memref<1x10x12x8x8xf32, #tpu.memory_space<vmem>>, vector<1x1x12x8x8xf32>
    %30 = vector.shape_cast %29 : vector<1x1x12x8x8xf32> to vector<12x8x8xf32>
    %31 = vector.shape_cast %28 : vector<12x8x8xf32> to vector<1x1x12x8x8xf32>
    tpu.vector_store %arg4[%c0_32, %c3, %c0_33, %c0_34, %c0_35], %31 {strides = array<i32>} : memref<1x10x12x8x8xf32, #tpu.memory_space<vmem>>, vector<1x1x12x8x8xf32>,
    %32 = vector.extract_strided_slice %3 {offsets = [0, 8, 8], sizes = [12, 8, 8], strides = [1, 1, 1]} : vector<12x16x16xf32> to vector<12x8x8xf32>
    %c0_36 = arith.constant 0 : index
    %c8 = arith.constant 8 : index
    %c0_37 = arith.constant 0 : index
    %c0_38 = arith.constant 0 : index
    %c0_39 = arith.constant 0 : index
    %33 = vector.load %arg4[%c0_36, %c8, %c0_37, %c0_38, %c0_39] : memref<1x10x12x8x8xf32, #tpu.memory_space<vmem>>, vector<1x1x12x8x8xf32>
    %34 = vector.shape_cast %33 : vector<1x1x12x8x8xf32> to vector<12x8x8xf32>
    %35 = vector.shape_cast %32 : vector<12x8x8xf32> to vector<1x1x12x8x8xf32>
    tpu.vector_store %arg4[%c0_36, %c8, %c0_37, %c0_38, %c0_39], %35 {strides = array<i32>} : memref<1x10x12x8x8xf32, #tpu.memory_space<vmem>>, vector<1x1x12x8x8xf32>,
    %36 = vector.extract_strided_slice %1 {offsets = [0, 4, 4], sizes = [12, 8, 8], strides = [1, 1, 1]} : vector<12x16x16xf32> to vector<12x8x8xf32>
    %c0_40 = arith.constant 0 : index
    %c4 = arith.constant 4 : index
    %c0_41 = arith.constant 0 : index
    %c0_42 = arith.constant 0 : index
    %c0_43 = arith.constant 0 : index
    %37 = vector.load %arg4[%c0_40, %c4, %c0_41, %c0_42, %c0_43] : memref<1x10x12x8x8xf32, #tpu.memory_space<vmem>>, vector<1x1x12x8x8xf32>
    %38 = vector.shape_cast %37 : vector<1x1x12x8x8xf32> to vector<12x8x8xf32>
    %39 = vector.shape_cast %36 : vector<12x8x8xf32> to vector<1x1x12x8x8xf32>
    tpu.vector_store %arg4[%c0_40, %c4, %c0_41, %c0_42, %c0_43], %39 {strides = array<i32>} : memref<1x10x12x8x8xf32, #tpu.memory_space<vmem>>, vector<1x1x12x8x8xf32>,
    %40 = vector.extract_strided_slice %3 {offsets = [0, 4, 4], sizes = [12, 8, 8], strides = [1, 1, 1]} : vector<12x16x16xf32> to vector<12x8x8xf32>
    %c0_44 = arith.constant 0 : index
    %c9 = arith.constant 9 : index
    %c0_45 = arith.constant 0 : index
    %c0_46 = arith.constant 0 : index
    %c0_47 = arith.constant 0 : index
    %41 = vector.load %arg4[%c0_44, %c9, %c0_45, %c0_46, %c0_47] : memref<1x10x12x8x8xf32, #tpu.memory_space<vmem>>, vector<1x1x12x8x8xf32>
    %42 = vector.shape_cast %41 : vector<1x1x12x8x8xf32> to vector<12x8x8xf32>
    %43 = vector.shape_cast %40 : vector<12x8x8xf32> to vector<1x1x12x8x8xf32>
    tpu.vector_store %arg4[%c0_44, %c9, %c0_45, %c0_46, %c0_47], %43 {strides = array<i32>} : memref<1x10x12x8x8xf32, #tpu.memory_space<vmem>>, vector<1x1x12x8x8xf32>,
    return
  }
  func.func @transform_0(%arg0: i32, %arg1: i32) -> (i32, i32, i32, i32) {
    %c0_i32 = arith.constant 0 : i32
    %c0_i32_0 = arith.constant 0 : i32
    %c0_i32_1 = arith.constant 0 : i32
    return %arg0, %arg1, %c0_i32, %c0_i32_0 : i32, i32, i32, i32
  }
  func.func @transform_1(%arg0: i32, %arg1: i32) -> (i32, i32, i32, i32) {
    %c0_i32 = arith.constant 0 : i32
    %c0_i32_0 = arith.constant 0 : i32
    %c0_i32_1 = arith.constant 0 : i32
    return %arg0, %arg1, %c0_i32, %c0_i32_0 : i32, i32, i32, i32
  }
  func.func @transform_2(%arg0: i32, %arg1: i32) -> (i32, i32, i32, i32, i32) {
    %c0_i32 = arith.constant 0 : i32
    %c0_i32_0 = arith.constant 0 : i32
    %c0_i32_1 = arith.constant 0 : i32
    %c0_i32_2 = arith.constant 0 : i32
    return %arg0, %c0_i32, %arg1, %c0_i32_0, %c0_i32_1 : i32, i32, i32, i32, i32
  }
}

</mosaic_0001>

<bundles_post_ra>
// kernel: tpu_custom_call.1
= control target key start
LH: loop header
LB: loop body
LE: loop exit
PB: predicated region body
PF: predicated region fallthrough
CT: control target
= control target key end

     0   :  { %7 = vsyncpa [#allocation3], 0  ;;  %s2043_s0 = inlined_call_operand.hbm [shape: f32[2,12,16,16], index: 0, kind: input, shape index: {}]   ;;  %s2044_s1 = inlined_call_operand.hbm [shape: f32[2,12,16,16], index: 1, kind: input, shape index: {}]   ;;  %s2045_s2 = inlined_call_operand.vmem [shape: f32[2,10,12,8,8], index: 2, kind: output, shape index: {}]  }
   0x1   :  { %9 = vsyncpa [#allocation3 + $0x1], 0 }
   0x2   :  { %10 = vsyncpa [#allocation5], 0 }
   0x3   :  { %12 = vsyncpa [#allocation5 + $0x1], 0  ;;  %s1245_s9 = smov 0   ;;  %s1247_s10 = smov 0  }
   0x4   :  { %s1249_s11 = smov 0   ;;  %s1251_s12 = smov 0  }
   0x5   :  { %s1253_s13 = smov 0   ;;  %s1255_s14 = smov 0  }
   0x6 LB: > { %s900_s15 = sadd.s32 4294967295, %s1222_s14   ;;  %s30_s16 = sadd.s32 1, %s1218_s13  ;;  %s1222_s14 = sphi %s1255_s14, %s18_s14   ;;  %s1218_s13 = sphi %s1253_s13, %s2053_s13   ;;  %s1214_s12 = sphi %s1251_s12, %s2052_s12   ;;  %s1210_s11 = sphi %s1249_s11, %s2051_s11   ;;  %s1206_s10 = sphi %s1247_s10, %s2050_s10   ;;  %s1202_s9 = sphi %s1245_s9, %s2049_s9  }
   0x7   : > { %p32_p0 = scmp.ge.s32.totalorder %s30_s16, 2  ;;  %s39_s17 = sadd.s32 1, %s1210_s11 }
   0x8   : > { %p46_p1 = scmp.ne.s32.totalorder %s1210_s11, %s1206_s10  ;;  %p47_p2 = scmp.eq.s32.totalorder %s1222_s14, 0 }
   0x9   : > { %s2055_s16 = smov (%p32_p0, %s30_s16), 0  ;;  %p52_p4 = scmp.ne.s32.totalorder %s1206_s10, %s1202_s9 }
   0xa   : > { %p48_p3 = por %p47_p2, %p46_p1  ;;  %s34_s18 = ssub.s32 %s1218_s13, %s2055_s16 }
   0xb   : > { %p53_p5 = scmp.eq.s32.totalorder %s900_s15, 0  ;;  %p37_p6 = scmp.eq.s32.totalorder %s34_s18, 0 }
   0xc   : > { %p1059_p8 = scmp.lt.s32.totalorder %s1222_s14, 2  ;;  %s1293_s21 = sand.u32 1, %s1210_s11  }
   0xd   : > { %p1284_p7 = por %p53_p5, %p52_p4  ;;  %s1043_s22 = smul.u32 3072, %s1218_s13 }
   0xe   : > { %s1290_s20 = scalar_select %p37_p6, %s1210_s11, %s39_s17  }
   0xf   : > { %s1042_s23 = smul.u32 192, %s1293_s21  ;;  %s145_s26 = scalar_lea.hbm %s2043_s0, %s1043_s22 }
  0x10   : > { %p1302_p9 = pnand %p1059_p8, %p48_p3  ;;  %s133_s30 = scalar_lea.sflag [#allocation3], %s1293_s21 }
  0x11   : > { %s136_s28 = scalar_lea.vmem [#allocation2], %s1042_s23  ;;  %s1224_s4 = smov [#allocation2]  }
  0x12   : > { %s146_s29 = sshll.u32 %s136_s28, 4  ;;  %p1114_p10 = pneg %p1302_p9  ;;  %s147_s29 = int_to_ptr.vmem [resolvable:$true] %s146_s29 }
  0x13   : > { %s1125_s3 = scalar_lea.vmem %s147_s29, 3072  ;;  %s1130_s5 = sshll.u32 %s1224_s4, 4  ;;  %s1131_s5 = int_to_ptr.vmem [resolvable:$false] %s1130_s5 }
  0x14   : > { %p1126_p11 = scmp.ne.s32.totalorder %s147_s29, %s1125_s3  ;;  %s1132_s6 = scalar_lea.vmem %s1131_s5, 6144 }
  0x15   : > { %p1133_p0 = scmp.lt.s32.totalorder %s147_s29, %s1131_s5  ;;  %p1134_p1 = scmp.lt.s32.totalorder %s1132_s6, %s1125_s3 }
  0x16   : > { %p1128_p12 = pnand %p1126_p11, %p1114_p10 }
  0x17   : > { %p1135_p2 = por %p1134_p1, %p1133_p0 }
  0x18   : > { %p1129_p13 = pneg %p1128_p12 }
  0x1a   : > { %p1136_p3 = pnand %p1135_p2, %p1129_p13 }
  0x1c   : > { %1139 = shalt.err (!%p1136_p3)
}
  0x1d   : > { %s1225_s7 = smov 128   ;;  %s1226_s8 = smov 8  }
  0x1e   : > { %1055 = dma.hbm_to_vmem [thread:$0]  (!%p1302_p9), %s145_s26, 3072, %s147_s29, %s133_s30, %s1225_s7, %s1225_s7, %s1226_s8  }
  0x1f   : > { %p906_p4 = scmp.ge.s32.totalorder %s1222_s14, 1  ;;  %p178_p5 = scmp.lt.s32.totalorder %s1222_s14, 3 }
  0x20   : > { %s169_s18 = scalar_lea.hbm %s2044_s1, %s1043_s22  ;;  %s160_s24 = scalar_lea.vmem [#allocation4], %s1042_s23 }
  0x21   : > { %p1316_p6 = pnand %p906_p4, %p178_p5  ;;  %s170_s25 = sshll.u32 %s160_s24, 4  ;;  %s171_s25 = int_to_ptr.vmem [resolvable:$true] %s170_s25 }
  0x22   : > { %s157_s28 = scalar_lea.sflag [#allocation5], %s1293_s21  ;;  %s1153_s3 = scalar_lea.vmem %s171_s25, 3072 }
  0x23   : > { %p1154_p8 = scmp.ne.s32.totalorder %s171_s25, %s1153_s3  ;;  %s1227_s26 = smov [#allocation4]  }
  0x24   : > { %s1158_s29 = sshll.u32 %s1227_s26, 4  ;;  %s1159_s29 = int_to_ptr.vmem [resolvable:$false] %s1158_s29 }
  0x25   : > { %p1156_p11 = pnand %p1154_p8, %p1114_p10  ;;  %s1160_s30 = scalar_lea.vmem %s1159_s29, 6144 }
  0x26   : > { %p1161_p13 = scmp.lt.s32.totalorder %s171_s25, %s1159_s29  ;;  %p1162_p0 = scmp.lt.s32.totalorder %s1160_s30, %s1153_s3 }
  0x27   : > { %p1157_p12 = pneg %p1156_p11 }
  0x28   : > { %p1163_p1 = por %p1162_p0, %p1161_p13 }
  0x2a   : > { %p1164_p2 = pnand %p1163_p1, %p1157_p12 }
  0x2c   : > { %1167 = shalt.err (!%p1164_p2)
}
  0x2d   : > { %1058 = dma.hbm_to_vmem [thread:$0]  (!%p1302_p9), %s169_s18, 3072, %s171_s25, %s157_s28, %s1225_s7, %s1225_s7, %s1226_s8  }
  0x2e   : > { %182 = sbr.rel (%p1316_p6) target bundleno = 367 (0x16f), region = 28  ;;  %s184_s21 = sand.u32 (!%p1316_p6), 1, %s1206_s10  }
  0x2f   : > { %s1046_s22 = smul.u32 (!%p1316_p6), 192, %s184_s21  ;;  %s185_s23 = scalar_lea.sflag (!%p1316_p6), [#allocation3], %s184_s21 }
  0x31   : > { %s1334_s4 = scalar_lea.vmem (!%p1316_p6), [#allocation2], %s1046_s22 }
  0x33   : > { %1193 = dma.done.wait (%p1284_p7), %s185_s23, 3072  }
  0x34   : > { %1195 = vsyncadd (%p1284_p7), %s185_s23, 4294964224  ;;  %s194_s5 = scalar_lea.sflag [#allocation5], %s184_s21  ;;  %s1340_s6 = scalar_lea.vmem [#allocation4], %s1046_s22 }
  0x35   : > { %1197 = dma.done.wait (%p1284_p7), %s194_s5, 3072  }
  0x36   : > { %1199 = vsyncadd (%p1284_p7), %s194_s5, 4294964224  ;;  %p230_p9 = scmp.lt.s32.totalorder %s1214_s12, 1  ;;  %v1354_v0 = vld [vmem:[%s1334_s4 + $0x20] sm:$0xff]  ;;  %vm287_vm0 = vcmask 64512   ;;  %v1360_v2 = vld [vmem:[%s1334_s4 + $0x30] sm:$0xff]  ;;  %s1229_s19 = smov 124  }
  0x37   : > { %v1357_v1 = vld [vmem:[%s1334_s4] sm:$0xff]  ;;  %v1376_v3 = vld [vmem:[%s1334_s4 + $0x10] sm:$0xff]  ;;  %v1500_v24 = vld [vmem:[%s1334_s4 + $0x18] sm:$0xff]  ;;  %vm658_vm1 = vcmask 60416   ;;  %vm656_vm2 = vcmask 64516  }
  0x38   : > { %s2057_s12 = smov (!%p230_p9, %s1214_s12), 1  ;;  %v1379_v4 = vld [vmem:[%s1334_s4 + $0x50] sm:$0xff]  ;;  %v1388_v5 = vld [vmem:[%s1334_s4 + $0x40] sm:$0xff]  ;;  %v1516_v25 = vld [vmem:[%s1334_s4 + $0x8] sm:$0xff] }
  0x39   : > { %s1047_s27 = smul.u32 960, %s2057_s12  ;;  %s1228_s12 = smov 120   ;;  %v1391_v6 = vld [vmem:[%s1334_s4 + $0x70] sm:$0xff]  ;;  %v1394_v7 = vld [vmem:[%s1334_s4 + $0x60] sm:$0xff]  ;;  %v1519_v26 = vld [vmem:[%s1334_s4 + $0x38] sm:$0xff] }
  0x3a   : > { %329 = vrot.lane.b32.xlu1 %v1354_v0, %s1228_s12  ;;  %325 = vrot.lane.b32.xlu0 %v1357_v1, %s1228_s12  ;;  %v1406_v8 = vld [vmem:[%s1334_s4 + $0x90] sm:$0xff]  ;;  %v1409_v9 = vld [vmem:[%s1334_s4 + $0x80] sm:$0xff] }
  0x3b   : > { %s1351_s9 = scalar_lea.vmem %s2045_s2, %s1047_s27  ;;  %v1412_v10 = vld [vmem:[%s1334_s4 + $0xb0] sm:$0xff]  ;;  %v1424_v11 = vld [vmem:[%s1334_s4 + $0xa0] sm:$0xff]  ;;  %v1528_v27 = vld [vmem:[%s1334_s4 + $0x28] sm:$0xff] }
  0x3c   : > { %290 = vst.msk [vmem:[%s1351_s9 + $0x10] sm:$0xff] %vm287_vm0, %v1354_v0  ;;  %288 = vst.msk [vmem:[%s1351_s9] sm:$0xff] %vm287_vm0, %v1357_v1  ;;  %v1427_v12 = vld [vmem:[%s1340_s6 + $0x10] sm:$0xff]  ;;  %v1430_v13 = vld [vmem:[%s1340_s6] sm:$0xff] }
  0x3d   : > { %291 = vst.msk [vmem:[%s1351_s9 + $0x18] sm:$0xff] %vm287_vm0, %v1360_v2  ;;  %289 = vst.msk [vmem:[%s1351_s9 + $0x8] sm:$0xff] %vm287_vm0, %v1376_v3  ;;  %v1446_v14 = vld [vmem:[%s1340_s6 + $0x30] sm:$0xff]  ;;  %v1449_v15 = vld [vmem:[%s1340_s6 + $0x20] sm:$0xff] }
  0x3e   : > { %293 = vst.msk [vmem:[%s1351_s9 + $0x28] sm:$0xff] %vm287_vm0, %v1379_v4  ;;  %292 = vst.msk [vmem:[%s1351_s9 + $0x20] sm:$0xff] %vm287_vm0, %v1388_v5  ;;  %331 = vrot.lane.b32.xlu1 %v1360_v2, %s1228_s12  ;;  %327 = vrot.lane.b32.xlu0 %v1376_v3, %s1228_s12 }
  0x3f   : > { %295 = vst.msk [vmem:[%s1351_s9 + $0x38] sm:$0xff] %vm287_vm0, %v1391_v6  ;;  %294 = vst.msk [vmem:[%s1351_s9 + $0x30] sm:$0xff] %vm287_vm0, %v1394_v7  ;;  %v1458_v16 = vld [vmem:[%s1340_s6 + $0x50] sm:$0xff]  ;;  %v1461_v17 = vld [vmem:[%s1340_s6 + $0x40] sm:$0xff] }
  0x40   : > { %297 = vst.msk [vmem:[%s1351_s9 + $0x48] sm:$0xff] %vm287_vm0, %v1406_v8  ;;  %296 = vst.msk [vmem:[%s1351_s9 + $0x40] sm:$0xff] %vm287_vm0, %v1409_v9  ;;  %v1464_v18 = vld [vmem:[%s1340_s6 + $0x70] sm:$0xff]  ;;  %v1476_v19 = vld [vmem:[%s1340_s6 + $0x60] sm:$0xff] }
  0x41   : > { %299 = vst.msk [vmem:[%s1351_s9 + $0x58] sm:$0xff] %vm287_vm0, %v1412_v10  ;;  %298 = vst.msk [vmem:[%s1351_s9 + $0x50] sm:$0xff] %vm287_vm0, %v1424_v11  ;;  %v1479_v20 = vld [vmem:[%s1340_s6 + $0x90] sm:$0xff]  ;;  %v1482_v21 = vld [vmem:[%s1340_s6 + $0x80] sm:$0xff] }
  0x42   : > { %909 = vst.msk [vmem:[%s1351_s9 + $0x1e8] sm:$0xff] %vm287_vm0, %v1427_v12  ;;  %908 = vst.msk [vmem:[%s1351_s9 + $0x1e0] sm:$0xff] %vm287_vm0, %v1430_v13  ;;  %v1494_v22 = vld [vmem:[%s1340_s6 + $0xb0] sm:$0xff]  ;;  %v1497_v23 = vld [vmem:[%s1340_s6 + $0xa0] sm:$0xff] }
  0x43   : > { %911 = vst.msk [vmem:[%s1351_s9 + $0x1f8] sm:$0xff] %vm287_vm0, %v1446_v14  ;;  %910 = vst.msk [vmem:[%s1351_s9 + $0x1f0] sm:$0xff] %vm287_vm0, %v1449_v15  ;;  %335 = vrot.lane.b32.xlu1 %v1379_v4, %s1228_s12  ;;  %333 = vrot.lane.b32.xlu0 %v1388_v5, %s1228_s12 }
  0x44   : > { %913 = vst.msk [vmem:[%s1351_s9 + $0x208] sm:$0xff] %vm287_vm0, %v1458_v16  ;;  %912 = vst.msk [vmem:[%s1351_s9 + $0x200] sm:$0xff] %vm287_vm0, %v1461_v17  ;;  %v1531_v28 = vld [vmem:[%s1334_s4 + $0x58] sm:$0xff]  ;;  %v1534_v29 = vld [vmem:[%s1334_s4 + $0x48] sm:$0xff] }
  0x45   : > { %915 = vst.msk [vmem:[%s1351_s9 + $0x218] sm:$0xff] %vm287_vm0, %v1464_v18  ;;  %914 = vst.msk [vmem:[%s1351_s9 + $0x210] sm:$0xff] %vm287_vm0, %v1476_v19  ;;  %v1546_v30 = vld [vmem:[%s1334_s4 + $0x78] sm:$0xff]  ;;  %v1549_v31 = vld [vmem:[%s1334_s4 + $0x68] sm:$0xff] }
  0x46   : > { %917 = vst.msk [vmem:[%s1351_s9 + $0x228] sm:$0xff] %vm287_vm0, %v1479_v20  ;;  %916 = vst.msk [vmem:[%s1351_s9 + $0x220] sm:$0xff] %vm287_vm0, %v1482_v21  ;;  %v1552_v32 = vld [vmem:[%s1334_s4 + $0x98] sm:$0xff]  ;;  %v1564_v33 = vld [vmem:[%s1334_s4 + $0x88] sm:$0xff] }
  0x47   : > { %919 = vst.msk [vmem:[%s1351_s9 + $0x238] sm:$0xff] %vm287_vm0, %v1494_v22  ;;  %918 = vst.msk [vmem:[%s1351_s9 + $0x230] sm:$0xff] %vm287_vm0, %v1497_v23  ;;  %v1567_v34 = vld [vmem:[%s1334_s4 + $0xb8] sm:$0xff]  ;;  %v1570_v35 = vld [vmem:[%s1334_s4 + $0xa8] sm:$0xff] }
  0x48   : > { %945 = vst.msk [vmem:[%s1351_s9 + $0xc8] sm:$0xff] %vm287_vm0, %v1500_v24  ;;  %944 = vst.msk [vmem:[%s1351_s9 + $0xc0] sm:$0xff] %vm287_vm0, %v1516_v25  ;;  %339 = vrot.lane.b32.xlu1 %v1391_v6, %s1228_s12  ;;  %337 = vrot.lane.b32.xlu0 %v1394_v7, %s1228_s12 }
  0x49   : > { %947 = vst.msk [vmem:[%s1351_s9 + $0xd8] sm:$0xff] %vm287_vm0, %v1519_v26  ;;  %946 = vst.msk [vmem:[%s1351_s9 + $0xd0] sm:$0xff] %vm287_vm0, %v1528_v27  ;;  %v1586_v36 = vld [vmem:[%s1340_s6 + $0x18] sm:$0xff]  ;;  %v1589_v37 = vld [vmem:[%s1340_s6 + $0x8] sm:$0xff] }
  0x4a   : > { %949 = vst.msk [vmem:[%s1351_s9 + $0xe8] sm:$0xff] %vm287_vm0, %v1531_v28  ;;  %948 = vst.msk [vmem:[%s1351_s9 + $0xe0] sm:$0xff] %vm287_vm0, %v1534_v29  ;;  %v1598_v38 = vld [vmem:[%s1340_s6 + $0x38] sm:$0xff]  ;;  %v1601_v39 = vld [vmem:[%s1340_s6 + $0x28] sm:$0xff] }
  0x4b   : > { %951 = vst.msk [vmem:[%s1351_s9 + $0xf8] sm:$0xff] %vm287_vm0, %v1546_v30  ;;  %950 = vst.msk [vmem:[%s1351_s9 + $0xf0] sm:$0xff] %vm287_vm0, %v1549_v31  ;;  %v1604_v40 = vld [vmem:[%s1340_s6 + $0x58] sm:$0xff]  ;;  %v1616_v41 = vld [vmem:[%s1340_s6 + $0x48] sm:$0xff] }
  0x4c   : > { %953 = vst.msk [vmem:[%s1351_s9 + $0x108] sm:$0xff] %vm287_vm0, %v1552_v32  ;;  %952 = vst.msk [vmem:[%s1351_s9 + $0x100] sm:$0xff] %vm287_vm0, %v1564_v33  ;;  %v1619_v42 = vld [vmem:[%s1340_s6 + $0x78] sm:$0xff]  ;;  %v1622_v43 = vld [vmem:[%s1340_s6 + $0x68] sm:$0xff] }
  0x4d   : > { %955 = vst.msk [vmem:[%s1351_s9 + $0x118] sm:$0xff] %vm287_vm0, %v1567_v34  ;;  %954 = vst.msk [vmem:[%s1351_s9 + $0x110] sm:$0xff] %vm287_vm0, %v1570_v35  ;;  %v1634_v44 = vld [vmem:[%s1340_s6 + $0x98] sm:$0xff]  ;;  %v1637_v45 = vld [vmem:[%s1340_s6 + $0x88] sm:$0xff] }
  0x4e   : > { %957 = vst.msk [vmem:[%s1351_s9 + $0x2a8] sm:$0xff] %vm287_vm0, %v1586_v36  ;;  %956 = vst.msk [vmem:[%s1351_s9 + $0x2a0] sm:$0xff] %vm287_vm0, %v1589_v37  ;;  %v1640_v46 = vld [vmem:[%s1340_s6 + $0xb8] sm:$0xff]  ;;  %343 = vrot.lane.b32.xlu1 %v1406_v8, %s1228_s12 }
  0x4f   : > { %959 = vst.msk [vmem:[%s1351_s9 + $0x2b8] sm:$0xff] %vm287_vm0, %v1598_v38  ;;  %958 = vst.msk [vmem:[%s1351_s9 + $0x2b0] sm:$0xff] %vm287_vm0, %v1601_v39  ;;  %341 = vrot.lane.b32.xlu0 %v1409_v9, %s1228_s12  ;;  %v1656_v47 = vld [vmem:[%s1340_s6 + $0xa8] sm:$0xff] }
  0x50   : > { %961 = vst.msk [vmem:[%s1351_s9 + $0x2c8] sm:$0xff] %vm287_vm0, %v1604_v40  ;;  %960 = vst.msk [vmem:[%s1351_s9 + $0x2c0] sm:$0xff] %vm287_vm0, %v1616_v41 }
  0x51   : > { %963 = vst.msk [vmem:[%s1351_s9 + $0x2d8] sm:$0xff] %vm287_vm0, %v1619_v42  ;;  %962 = vst.msk [vmem:[%s1351_s9 + $0x2d0] sm:$0xff] %vm287_vm0, %v1622_v43 }
  0x52   : > { %965 = vst.msk [vmem:[%s1351_s9 + $0x2e8] sm:$0xff] %vm287_vm0, %v1634_v44  ;;  %964 = vst.msk [vmem:[%s1351_s9 + $0x2e0] sm:$0xff] %vm287_vm0, %v1637_v45  ;;  %347 = vrot.lane.b32.xlu1 %v1412_v10, %s1228_s12 }
  0x53   : > { %967 = vst.msk [vmem:[%s1351_s9 + $0x2f8] sm:$0xff] %vm287_vm0, %v1640_v46  ;;  %966 = vst.msk [vmem:[%s1351_s9 + $0x2f0] sm:$0xff] %vm287_vm0, %v1656_v47  ;;  %345 = vrot.lane.b32.xlu0 %v1424_v11, %s1228_s12 }
  0x56   : > { %388 = vrot.lane.b32.xlu1 %v1427_v12, %s1228_s12 }
  0x57   : > { %386 = vrot.lane.b32.xlu0 %v1430_v13, %s1228_s12 }
  0x5a   : > { %392 = vrot.lane.b32.xlu1 %v1446_v14, %s1228_s12 }
  0x5b   : > { %390 = vrot.lane.b32.xlu0 %v1449_v15, %s1228_s12 }
  0x5e   : > { %396 = vrot.lane.b32.xlu1 %v1458_v16, %s1228_s12 }
  0x5f   : > { %394 = vrot.lane.b32.xlu0 %v1461_v17, %s1228_s12 }
  0x62   : > { %400 = vrot.lane.b32.xlu1 %v1464_v18, %s1228_s12 }
  0x63   : > { %398 = vrot.lane.b32.xlu0 %v1476_v19, %s1228_s12 }
  0x66   : > { %404 = vrot.lane.b32.xlu1 %v1479_v20, %s1228_s12 }
  0x67   : > { %402 = vrot.lane.b32.xlu0 %v1482_v21, %s1228_s12 }
  0x6a   : > { %408 = vrot.lane.b32.xlu1 %v1494_v22, %s1228_s12 }
  0x6b   : > { %406 = vrot.lane.b32.xlu0 %v1497_v23, %s1228_s12 }
  0x6e   : > { %475 = vrot.lane.b32.xlu1 %v1500_v24, %s1228_s12 }
  0x6f   : > { %473 = vrot.lane.b32.xlu0 %v1516_v25, %s1228_s12 }
  0x72   : > { %479 = vrot.lane.b32.xlu1 %v1519_v26, %s1228_s12 }
  0x73   : > { %477 = vrot.lane.b32.xlu0 %v1528_v27, %s1228_s12 }
  0x76   : > { %483 = vrot.lane.b32.xlu1 %v1531_v28, %s1228_s12 }
  0x77   : > { %481 = vrot.lane.b32.xlu0 %v1534_v29, %s1228_s12 }
  0x7a   : > { %487 = vrot.lane.b32.xlu1 %v1546_v30, %s1228_s12 }
  0x7b   : > { %485 = vrot.lane.b32.xlu0 %v1549_v31, %s1228_s12 }
  0x7e   : > { %491 = vrot.lane.b32.xlu1 %v1552_v32, %s1228_s12 }
  0x7f   : > { %489 = vrot.lane.b32.xlu0 %v1564_v33, %s1228_s12 }
  0x82   : > { %495 = vrot.lane.b32.xlu1 %v1567_v34, %s1228_s12 }
  0x83   : > { %493 = vrot.lane.b32.xlu0 %v1570_v35, %s1228_s12 }
  0x86   : > { %536 = vrot.lane.b32.xlu1 %v1586_v36, %s1228_s12 }
  0x87   : > { %534 = vrot.lane.b32.xlu0 %v1589_v37, %s1228_s12 }
  0x8a   : > { %540 = vrot.lane.b32.xlu1 %v1598_v38, %s1228_s12 }
  0x8b   : > { %538 = vrot.lane.b32.xlu0 %v1601_v39, %s1228_s12 }
  0x8e   : > { %544 = vrot.lane.b32.xlu1 %v1604_v40, %s1228_s12 }
  0x8f   : > { %542 = vrot.lane.b32.xlu0 %v1616_v41, %s1228_s12 }
  0x92   : > { %548 = vrot.lane.b32.xlu1 %v1619_v42, %s1228_s12 }
  0x93   : > { %546 = vrot.lane.b32.xlu0 %v1622_v43, %s1228_s12 }
  0x96   : > { %552 = vrot.lane.b32.xlu1 %v1634_v44, %s1228_s12 }
  0x97   : > { %550 = vrot.lane.b32.xlu0 %v1637_v45, %s1228_s12 }
  0x9a   : > { %556 = vrot.lane.b32.xlu1 %v1640_v46, %s1228_s12 }
  0x9b   : > { %554 = vrot.lane.b32.xlu0 %v1656_v47, %s1228_s12 }
  0x9e   : > { %585 = vrot.lane.b32.xlu1 %v1516_v25, %s1229_s19 }
  0x9f   : > { %583 = vrot.lane.b32.xlu0 %v1357_v1, %s1229_s19 }
  0xa2   : > { %589 = vrot.lane.b32.xlu1 %v1500_v24, %s1229_s19 }
  0xa3   : > { %587 = vrot.lane.b32.xlu0 %v1376_v3, %s1229_s19 }
  0xa6   : > { %593 = vrot.lane.b32.xlu1 %v1528_v27, %s1229_s19 }
  0xa7   : > { %591 = vrot.lane.b32.xlu0 %v1354_v0, %s1229_s19 }
  0xaa   : > { %597 = vrot.lane.b32.xlu1 %v1519_v26, %s1229_s19 }
  0xab   : > { %595 = vrot.lane.b32.xlu0 %v1360_v2, %s1229_s19 }
  0xac   : > { %v330_v48 = vpop.permute.xlu1 %329  ;;  %v326_v49 = vpop.permute.xlu0 %325 }
  0xad   : > { %922 = vst.msk [vmem:[%s1351_s9 + $0x70] sm:$0xff] %vm287_vm0, %v330_v48  ;;  %920 = vst.msk [vmem:[%s1351_s9 + $0x60] sm:$0xff] %vm287_vm0, %v326_v49 }
  0xae   : > { %601 = vrot.lane.b32.xlu1 %v1534_v29, %s1229_s19 }
  0xaf   : > { %599 = vrot.lane.b32.xlu0 %v1388_v5, %s1229_s19 }
  0xb0   : > { %v332_v50 = vpop.permute.xlu1 %331  ;;  %v328_v51 = vpop.permute.xlu0 %327 }
  0xb1   : > { %923 = vst.msk [vmem:[%s1351_s9 + $0x78] sm:$0xff] %vm287_vm0, %v332_v50  ;;  %921 = vst.msk [vmem:[%s1351_s9 + $0x68] sm:$0xff] %vm287_vm0, %v328_v51 }
  0xb2   : > { %605 = vrot.lane.b32.xlu1 %v1531_v28, %s1229_s19 }
  0xb3   : > { %603 = vrot.lane.b32.xlu0 %v1379_v4, %s1229_s19 }
  0xb5   : > { %v336_v52 = vpop.permute.xlu1 %335  ;;  %v334_v53 = vpop.permute.xlu0 %333 }
  0xb6   : > { %609 = vrot.lane.b32.xlu1 %v1549_v31, %s1229_s19  ;;  %925 = vst.msk [vmem:[%s1351_s9 + $0x88] sm:$0xff] %vm287_vm0, %v336_v52  ;;  %924 = vst.msk [vmem:[%s1351_s9 + $0x80] sm:$0xff] %vm287_vm0, %v334_v53 }
  0xb7   : > { %607 = vrot.lane.b32.xlu0 %v1394_v7, %s1229_s19 }
  0xba   : > { %613 = vrot.lane.b32.xlu1 %v1546_v30, %s1229_s19  ;;  %v340_v54 = vpop.permute.xlu1 %339  ;;  %v338_v55 = vpop.permute.xlu0 %337 }
  0xbb   : > { %611 = vrot.lane.b32.xlu0 %v1391_v6, %s1229_s19  ;;  %927 = vst.msk [vmem:[%s1351_s9 + $0x98] sm:$0xff] %vm287_vm0, %v340_v54  ;;  %926 = vst.msk [vmem:[%s1351_s9 + $0x90] sm:$0xff] %vm287_vm0, %v338_v55 }
  0xbe   : > { %617 = vrot.lane.b32.xlu1 %v1564_v33, %s1229_s19 }
  0xbf   : > { %615 = vrot.lane.b32.xlu0 %v1409_v9, %s1229_s19 }
  0xc0   : > { %v344_v56 = vpop.permute.xlu1 %343 }
  0xc1   : > { %v342_v57 = vpop.permute.xlu0 %341  ;;  %929 = vst.msk [vmem:[%s1351_s9 + $0xa8] sm:$0xff] %vm287_vm0, %v344_v56 }
  0xc2   : > { %928 = vst.msk [vmem:[%s1351_s9 + $0xa0] sm:$0xff] %vm287_vm0, %v342_v57  ;;  %621 = vrot.lane.b32.xlu1 %v1552_v32, %s1229_s19 }
  0xc3   : > { %619 = vrot.lane.b32.xlu0 %v1406_v8, %s1229_s19 }
  0xc4   : > { %v348_v58 = vpop.permute.xlu1 %347 }
  0xc5   : > { %v346_v59 = vpop.permute.xlu0 %345  ;;  %931 = vst.msk [vmem:[%s1351_s9 + $0xb8] sm:$0xff] %vm287_vm0, %v348_v58 }
  0xc6   : > { %930 = vst.msk [vmem:[%s1351_s9 + $0xb0] sm:$0xff] %vm287_vm0, %v346_v59  ;;  %625 = vrot.lane.b32.xlu1 %v1570_v35, %s1229_s19 }
  0xc7   : > { %623 = vrot.lane.b32.xlu0 %v1424_v11, %s1229_s19 }
  0xc8   : > { %v389_v60 = vpop.permute.xlu1 %388 }
  0xc9   : > { %v387_v61 = vpop.permute.xlu0 %386  ;;  %933 = vst.msk [vmem:[%s1351_s9 + $0x248] sm:$0xff] %vm287_vm0, %v389_v60 }
  0xca   : > { %932 = vst.msk [vmem:[%s1351_s9 + $0x240] sm:$0xff] %vm287_vm0, %v387_v61  ;;  %629 = vrot.lane.b32.xlu1 %v1567_v34, %s1229_s19 }
  0xcb   : > { %627 = vrot.lane.b32.xlu0 %v1412_v10, %s1229_s19 }
  0xcc   : > { %v393_v62 = vpop.permute.xlu1 %392 }
  0xcd   : > { %v391_v63 = vpop.permute.xlu0 %390  ;;  %935 = vst.msk [vmem:[%s1351_s9 + $0x258] sm:$0xff] %vm287_vm0, %v393_v62 }
  0xce   : > { %934 = vst.msk [vmem:[%s1351_s9 + $0x250] sm:$0xff] %vm287_vm0, %v391_v63  ;;  %684 = vrot.lane.b32.xlu1 %v1589_v37, %s1229_s19 }
  0xcf   : > { %682 = vrot.lane.b32.xlu0 %v1430_v13, %s1229_s19 }
  0xd0   : > { %v397_v0 = vpop.permute.xlu1 %396 }
  0xd1   : > { %v395_v1 = vpop.permute.xlu0 %394  ;;  %937 = vst.msk [vmem:[%s1351_s9 + $0x268] sm:$0xff] %vm287_vm0, %v397_v0 }
  0xd2   : > { %936 = vst.msk [vmem:[%s1351_s9 + $0x260] sm:$0xff] %vm287_vm0, %v395_v1  ;;  %688 = vrot.lane.b32.xlu1 %v1586_v36, %s1229_s19 }
  0xd3   : > { %686 = vrot.lane.b32.xlu0 %v1427_v12, %s1229_s19 }
  0xd4   : > { %v401_v2 = vpop.permute.xlu1 %400 }
  0xd5   : > { %v399_v3 = vpop.permute.xlu0 %398  ;;  %939 = vst.msk [vmem:[%s1351_s9 + $0x278] sm:$0xff] %vm287_vm0, %v401_v2 }
  0xd6   : > { %938 = vst.msk [vmem:[%s1351_s9 + $0x270] sm:$0xff] %vm287_vm0, %v399_v3  ;;  %692 = vrot.lane.b32.xlu1 %v1601_v39, %s1229_s19 }
  0xd7   : > { %690 = vrot.lane.b32.xlu0 %v1449_v15, %s1229_s19 }
  0xd8   : > { %v405_v4 = vpop.permute.xlu1 %404 }
  0xd9   : > { %v403_v5 = vpop.permute.xlu0 %402  ;;  %941 = vst.msk [vmem:[%s1351_s9 + $0x288] sm:$0xff] %vm287_vm0, %v405_v4 }
  0xda   : > { %940 = vst.msk [vmem:[%s1351_s9 + $0x280] sm:$0xff] %vm287_vm0, %v403_v5  ;;  %696 = vrot.lane.b32.xlu1 %v1598_v38, %s1229_s19 }
  0xdb   : > { %694 = vrot.lane.b32.xlu0 %v1446_v14, %s1229_s19 }
  0xdc   : > { %v409_v6 = vpop.permute.xlu1 %408 }
  0xdd   : > { %v407_v7 = vpop.permute.xlu0 %406  ;;  %943 = vst.msk [vmem:[%s1351_s9 + $0x298] sm:$0xff] %vm287_vm0, %v409_v6 }
  0xde   : > { %942 = vst.msk [vmem:[%s1351_s9 + $0x290] sm:$0xff] %vm287_vm0, %v407_v7  ;;  %700 = vrot.lane.b32.xlu1 %v1616_v41, %s1229_s19 }
  0xdf   : > { %698 = vrot.lane.b32.xlu0 %v1461_v17, %s1229_s19 }
  0xe0   : > { %v476_v8 = vpop.permute.xlu1 %475 }
  0xe1   : > { %v474_v9 = vpop.permute.xlu0 %473  ;;  %969 = vst.msk [vmem:[%s1351_s9 + $0x128] sm:$0xff] %vm287_vm0, %v476_v8 }
  0xe2   : > { %968 = vst.msk [vmem:[%s1351_s9 + $0x120] sm:$0xff] %vm287_vm0, %v474_v9  ;;  %704 = vrot.lane.b32.xlu1 %v1604_v40, %s1229_s19 }
  0xe3   : > { %702 = vrot.lane.b32.xlu0 %v1458_v16, %s1229_s19 }
  0xe4   : > { %v480_v10 = vpop.permute.xlu1 %479 }
  0xe5   : > { %v478_v11 = vpop.permute.xlu0 %477  ;;  %971 = vst.msk [vmem:[%s1351_s9 + $0x138] sm:$0xff] %vm287_vm0, %v480_v10 }
  0xe6   : > { %970 = vst.msk [vmem:[%s1351_s9 + $0x130] sm:$0xff] %vm287_vm0, %v478_v11  ;;  %708 = vrot.lane.b32.xlu1 %v1622_v43, %s1229_s19 }
  0xe7   : > { %706 = vrot.lane.b32.xlu0 %v1476_v19, %s1229_s19 }
  0xe8   : > { %v484_v12 = vpop.permute.xlu1 %483 }
  0xe9   : > { %v482_v13 = vpop.permute.xlu0 %481  ;;  %973 = vst.msk [vmem:[%s1351_s9 + $0x148] sm:$0xff] %vm287_vm0, %v484_v12 }
  0xea   : > { %972 = vst.msk [vmem:[%s1351_s9 + $0x140] sm:$0xff] %vm287_vm0, %v482_v13  ;;  %712 = vrot.lane.b32.xlu1 %v1619_v42, %s1229_s19 }
  0xeb   : > { %710 = vrot.lane.b32.xlu0 %v1464_v18, %s1229_s19 }
  0xec   : > { %v488_v14 = vpop.permute.xlu1 %487 }
  0xed   : > { %v486_v15 = vpop.permute.xlu0 %485  ;;  %975 = vst.msk [vmem:[%s1351_s9 + $0x158] sm:$0xff] %vm287_vm0, %v488_v14 }
  0xee   : > { %974 = vst.msk [vmem:[%s1351_s9 + $0x150] sm:$0xff] %vm287_vm0, %v486_v15  ;;  %716 = vrot.lane.b32.xlu1 %v1637_v45, %s1229_s19 }
  0xef   : > { %714 = vrot.lane.b32.xlu0 %v1482_v21, %s1229_s19 }
  0xf0   : > { %v492_v16 = vpop.permute.xlu1 %491 }
  0xf1   : > { %v490_v17 = vpop.permute.xlu0 %489  ;;  %977 = vst.msk [vmem:[%s1351_s9 + $0x168] sm:$0xff] %vm287_vm0, %v492_v16 }
  0xf2   : > { %976 = vst.msk [vmem:[%s1351_s9 + $0x160] sm:$0xff] %vm287_vm0, %v490_v17  ;;  %720 = vrot.lane.b32.xlu1 %v1634_v44, %s1229_s19 }
  0xf3   : > { %718 = vrot.lane.b32.xlu0 %v1479_v20, %s1229_s19 }
  0xf4   : > { %v496_v18 = vpop.permute.xlu1 %495 }
  0xf5   : > { %v494_v19 = vpop.permute.xlu0 %493  ;;  %979 = vst.msk [vmem:[%s1351_s9 + $0x178] sm:$0xff] %vm287_vm0, %v496_v18 }
  0xf6   : > { %978 = vst.msk [vmem:[%s1351_s9 + $0x170] sm:$0xff] %vm287_vm0, %v494_v19  ;;  %724 = vrot.lane.b32.xlu1 %v1656_v47, %s1229_s19 }
  0xf7   : > { %722 = vrot.lane.b32.xlu0 %v1497_v23, %s1229_s19 }
  0xf8   : > { %v537_v21 = vpop.permute.xlu1 %536 }
  0xf9   : > { %v535_v24 = vpop.permute.xlu0 %534  ;;  %981 = vst.msk [vmem:[%s1351_s9 + $0x308] sm:$0xff] %vm287_vm0, %v537_v21 }
  0xfa   : > { %980 = vst.msk [vmem:[%s1351_s9 + $0x300] sm:$0xff] %vm287_vm0, %v535_v24  ;;  %728 = vrot.lane.b32.xlu1 %v1640_v46, %s1229_s19 }
  0xfb   : > { %726 = vrot.lane.b32.xlu0 %v1494_v22, %s1229_s19 }
  0xfc   : > { %v541_v20 = vpop.permute.xlu1 %540 }
  0xfd   : > { %v539_v25 = vpop.permute.xlu0 %538  ;;  %983 = vst.msk [vmem:[%s1351_s9 + $0x318] sm:$0xff] %vm287_vm0, %v541_v20 }
  0xfe   : > { %982 = vst.msk [vmem:[%s1351_s9 + $0x310] sm:$0xff] %vm287_vm0, %v539_v25 }
 0x100   : > { %v545_v23 = vpop.permute.xlu1 %544 }
 0x101   : > { %v543_v26 = vpop.permute.xlu0 %542  ;;  %985 = vst.msk [vmem:[%s1351_s9 + $0x328] sm:$0xff] %vm287_vm0, %v545_v23 }
 0x102   : > { %984 = vst.msk [vmem:[%s1351_s9 + $0x320] sm:$0xff] %vm287_vm0, %v543_v26 }
 0x104   : > { %v549_v27 = vpop.permute.xlu1 %548 }
 0x105   : > { %v547_v28 = vpop.permute.xlu0 %546  ;;  %987 = vst.msk [vmem:[%s1351_s9 + $0x338] sm:$0xff] %vm287_vm0, %v549_v27 }
 0x106   : > { %986 = vst.msk [vmem:[%s1351_s9 + $0x330] sm:$0xff] %vm287_vm0, %v547_v28 }
 0x108   : > { %v553_v22 = vpop.permute.xlu1 %552 }
 0x109   : > { %v551_v29 = vpop.permute.xlu0 %550  ;;  %989 = vst.msk [vmem:[%s1351_s9 + $0x348] sm:$0xff] %vm287_vm0, %v553_v22 }
 0x10a   : > { %988 = vst.msk [vmem:[%s1351_s9 + $0x340] sm:$0xff] %vm287_vm0, %v551_v29 }
 0x10c   : > { %v557_v30 = vpop.permute.xlu1 %556 }
 0x10d   : > { %v555_v31 = vpop.permute.xlu0 %554  ;;  %991 = vst.msk [vmem:[%s1351_s9 + $0x358] sm:$0xff] %vm287_vm0, %v557_v30 }
 0x10e   : > { %990 = vst.msk [vmem:[%s1351_s9 + $0x350] sm:$0xff] %vm287_vm0, %v555_v31 }
 0x110   : > { %v586_v32 = vpop.permute.xlu1 %585 }
 0x111   : > { %v584_v33 = vpop.permute.xlu0 %583  ;;  %993 = vst.msk [vmem:[%s1351_s9 + $0x184] sm:$0xf] %vm658_vm1, %v586_v32 }
 0x112   : > { %992 = vst.msk [vmem:[%s1351_s9 + $0x17c] sm:$0xf0] %vm656_vm2, %v584_v33 }
 0x114   : > { %v590_v34 = vpop.permute.xlu1 %589 }
 0x115   : > { %v588_v35 = vpop.permute.xlu0 %587  ;;  %995 = vst.msk [vmem:[%s1351_s9 + $0x18c] sm:$0xf] %vm658_vm1, %v590_v34 }
 0x116   : > { %994 = vst.msk [vmem:[%s1351_s9 + $0x184] sm:$0xf0] %vm656_vm2, %v588_v35 }
 0x118   : > { %v594_v36 = vpop.permute.xlu1 %593 }
 0x119   : > { %v592_v37 = vpop.permute.xlu0 %591  ;;  %997 = vst.msk [vmem:[%s1351_s9 + $0x194] sm:$0xf] %vm658_vm1, %v594_v36 }
 0x11a   : > { %996 = vst.msk [vmem:[%s1351_s9 + $0x18c] sm:$0xf0] %vm656_vm2, %v592_v37 }
 0x11c   : > { %v598_v38 = vpop.permute.xlu1 %597 }
 0x11d   : > { %v596_v39 = vpop.permute.xlu0 %595  ;;  %999 = vst.msk [vmem:[%s1351_s9 + $0x19c] sm:$0xf] %vm658_vm1, %v598_v38 }
 0x11e   : > { %998 = vst.msk [vmem:[%s1351_s9 + $0x194] sm:$0xf0] %vm656_vm2, %v596_v39 }
 0x120   : > { %v602_v40 = vpop.permute.xlu1 %601 }
 0x121   : > { %v600_v41 = vpop.permute.xlu0 %599  ;;  %1001 = vst.msk [vmem:[%s1351_s9 + $0x1a4] sm:$0xf] %vm658_vm1, %v602_v40 }
 0x122   : > { %1000 = vst.msk [vmem:[%s1351_s9 + $0x19c] sm:$0xf0] %vm656_vm2, %v600_v41 }
 0x124   : > { %v606_v42 = vpop.permute.xlu1 %605 }
 0x125   : > { %v604_v43 = vpop.permute.xlu0 %603  ;;  %1003 = vst.msk [vmem:[%s1351_s9 + $0x1ac] sm:$0xf] %vm658_vm1, %v606_v42 }
 0x126   : > { %1002 = vst.msk [vmem:[%s1351_s9 + $0x1a4] sm:$0xf0] %vm656_vm2, %v604_v43 }
 0x128   : > { %v610_v44 = vpop.permute.xlu1 %609 }
 0x129   : > { %v608_v45 = vpop.permute.xlu0 %607  ;;  %1005 = vst.msk [vmem:[%s1351_s9 + $0x1b4] sm:$0xf] %vm658_vm1, %v610_v44 }
 0x12a   : > { %1004 = vst.msk [vmem:[%s1351_s9 + $0x1ac] sm:$0xf0] %vm656_vm2, %v608_v45 }
 0x12c   : > { %v614_v46 = vpop.permute.xlu1 %613 }
 0x12d   : > { %v612_v47 = vpop.permute.xlu0 %611  ;;  %1007 = vst.msk [vmem:[%s1351_s9 + $0x1bc] sm:$0xf] %vm658_vm1, %v614_v46 }
 0x12e   : > { %1006 = vst.msk [vmem:[%s1351_s9 + $0x1b4] sm:$0xf0] %vm656_vm2, %v612_v47 }
 0x130   : > { %v618_v48 = vpop.permute.xlu1 %617 }
 0x131   : > { %v616_v49 = vpop.permute.xlu0 %615  ;;  %1009 = vst.msk [vmem:[%s1351_s9 + $0x1c4] sm:$0xf] %vm658_vm1, %v618_v48 }
 0x132   : > { %1008 = vst.msk [vmem:[%s1351_s9 + $0x1bc] sm:$0xf0] %vm656_vm2, %v616_v49 }
 0x134   : > { %v622_v50 = vpop.permute.xlu1 %621 }
 0x135   : > { %v620_v51 = vpop.permute.xlu0 %619  ;;  %1011 = vst.msk [vmem:[%s1351_s9 + $0x1cc] sm:$0xf] %vm658_vm1, %v622_v50 }
 0x136   : > { %1010 = vst.msk [vmem:[%s1351_s9 + $0x1c4] sm:$0xf0] %vm656_vm2, %v620_v51 }
 0x138   : > { %v626_v52 = vpop.permute.xlu1 %625 }
 0x139   : > { %v624_v53 = vpop.permute.xlu0 %623  ;;  %1013 = vst.msk [vmem:[%s1351_s9 + $0x1d4] sm:$0xf] %vm658_vm1, %v626_v52 }
 0x13a   : > { %1012 = vst.msk [vmem:[%s1351_s9 + $0x1cc] sm:$0xf0] %vm656_vm2, %v624_v53 }
 0x13c   : > { %v630_v54 = vpop.permute.xlu1 %629 }
 0x13d   : > { %v628_v55 = vpop.permute.xlu0 %627  ;;  %1015 = vst.msk [vmem:[%s1351_s9 + $0x1dc] sm:$0xf] %vm658_vm1, %v630_v54 }
 0x13e   : > { %1014 = vst.msk [vmem:[%s1351_s9 + $0x1d4] sm:$0xf0] %vm656_vm2, %v628_v55 }
 0x140   : > { %v685_v56 = vpop.permute.xlu1 %684 }
 0x141   : > { %v683_v57 = vpop.permute.xlu0 %682  ;;  %1017 = vst.msk [vmem:[%s1351_s9 + $0x364] sm:$0xf] %vm658_vm1, %v685_v56 }
 0x142   : > { %1016 = vst.msk [vmem:[%s1351_s9 + $0x35c] sm:$0xf0] %vm656_vm2, %v683_v57 }
 0x144   : > { %v689_v58 = vpop.permute.xlu1 %688 }
 0x145   : > { %v687_v59 = vpop.permute.xlu0 %686  ;;  %1019 = vst.msk [vmem:[%s1351_s9 + $0x36c] sm:$0xf] %vm658_vm1, %v689_v58 }
 0x146   : > { %1018 = vst.msk [vmem:[%s1351_s9 + $0x364] sm:$0xf0] %vm656_vm2, %v687_v59 }
 0x148   : > { %v693_v60 = vpop.permute.xlu1 %692 }
 0x149   : > { %v691_v61 = vpop.permute.xlu0 %690  ;;  %1021 = vst.msk [vmem:[%s1351_s9 + $0x374] sm:$0xf] %vm658_vm1, %v693_v60 }
 0x14a   : > { %1020 = vst.msk [vmem:[%s1351_s9 + $0x36c] sm:$0xf0] %vm656_vm2, %v691_v61 }
 0x14c   : > { %v697_v62 = vpop.permute.xlu1 %696 }
 0x14d   : > { %v695_v63 = vpop.permute.xlu0 %694  ;;  %1023 = vst.msk [vmem:[%s1351_s9 + $0x37c] sm:$0xf] %vm658_vm1, %v697_v62 }
 0x14e   : > { %1022 = vst.msk [vmem:[%s1351_s9 + $0x374] sm:$0xf0] %vm656_vm2, %v695_v63 }
 0x150   : > { %v701_v0 = vpop.permute.xlu1 %700 }
 0x151   : > { %v699_v1 = vpop.permute.xlu0 %698  ;;  %1025 = vst.msk [vmem:[%s1351_s9 + $0x384] sm:$0xf] %vm658_vm1, %v701_v0 }
 0x152   : > { %1024 = vst.msk [vmem:[%s1351_s9 + $0x37c] sm:$0xf0] %vm656_vm2, %v699_v1 }
 0x154   : > { %v705_v2 = vpop.permute.xlu1 %704 }
 0x155   : > { %v703_v3 = vpop.permute.xlu0 %702  ;;  %1027 = vst.msk [vmem:[%s1351_s9 + $0x38c] sm:$0xf] %vm658_vm1, %v705_v2 }
 0x156   : > { %1026 = vst.msk [vmem:[%s1351_s9 + $0x384] sm:$0xf0] %vm656_vm2, %v703_v3 }
 0x158   : > { %v709_v4 = vpop.permute.xlu1 %708 }
 0x159   : > { %v707_v5 = vpop.permute.xlu0 %706  ;;  %1029 = vst.msk [vmem:[%s1351_s9 + $0x394] sm:$0xf] %vm658_vm1, %v709_v4 }
 0x15a   : > { %1028 = vst.msk [vmem:[%s1351_s9 + $0x38c] sm:$0xf0] %vm656_vm2, %v707_v5 }
 0x15c   : > { %v713_v6 = vpop.permute.xlu1 %712 }
 0x15d   : > { %v711_v7 = vpop.permute.xlu0 %710  ;;  %1031 = vst.msk [vmem:[%s1351_s9 + $0x39c] sm:$0xf] %vm658_vm1, %v713_v6 }
 0x15e   : > { %1030 = vst.msk [vmem:[%s1351_s9 + $0x394] sm:$0xf0] %vm656_vm2, %v711_v7 }
 0x160   : > { %v717_v8 = vpop.permute.xlu1 %716 }
 0x161   : > { %v715_v9 = vpop.permute.xlu0 %714  ;;  %1033 = vst.msk [vmem:[%s1351_s9 + $0x3a4] sm:$0xf] %vm658_vm1, %v717_v8 }
 0x162   : > { %1032 = vst.msk [vmem:[%s1351_s9 + $0x39c] sm:$0xf0] %vm656_vm2, %v715_v9 }
 0x164   : > { %v721_v10 = vpop.permute.xlu1 %720 }
 0x165   : > { %v719_v11 = vpop.permute.xlu0 %718  ;;  %1035 = vst.msk [vmem:[%s1351_s9 + $0x3ac] sm:$0xf] %vm658_vm1, %v721_v10 }
 0x166   : > { %1034 = vst.msk [vmem:[%s1351_s9 + $0x3a4] sm:$0xf0] %vm656_vm2, %v719_v11 }
 0x168   : > { %v725_v12 = vpop.permute.xlu1 %724 }
 0x169   : > { %v723_v13 = vpop.permute.xlu0 %722  ;;  %1037 = vst.msk [vmem:[%s1351_s9 + $0x3b4] sm:$0xf] %vm658_vm1, %v725_v12 }
 0x16a   : > { %1036 = vst.msk [vmem:[%s1351_s9 + $0x3ac] sm:$0xf0] %vm656_vm2, %v723_v13 }
 0x16c   : > { %v729_v14 = vpop.permute.xlu1 %728 }
 0x16d   : > { %v727_v15 = vpop.permute.xlu0 %726  ;;  %1039 = vst.msk [vmem:[%s1351_s9 + $0x3bc] sm:$0xf] %vm658_vm1, %v729_v14 }
 0x16e   : > { %1038 = vst.msk [vmem:[%s1351_s9 + $0x3b4] sm:$0xf0] %vm656_vm2, %v727_v15 }
 0x16f PF: > { %s18_s14 = sadd.s32 1, %s1222_s14   ;;  %s2049_s9 = smov %s1206_s10 }
 0x170   : > { %p15_p7 = scmp.ge.s32.totalorder %s18_s14, 4   ;;  %s2050_s10 = smov %s1210_s11 }
 0x171   : > { %s2051_s11 = smov %s1290_s20  ;;  %s2052_s12 = smov %s1218_s13 }
 0x172   : > { %s2053_s13 = smov %s2055_s16  ;;  %17 = sbr.rel (!%p15_p7) target bundleno = 6 (0x6), region = 90 }
 0x177   :  { %809 = vsyncpa [#allocation3], 1 }
 0x178   :  { %811 = vsyncpa [#allocation3 + $0x1], 1 }
 0x179   :  { %812 = vsyncpa [#allocation5], 1 }
 0x17a   :  { %814 = vsyncpa [#allocation5 + $0x1], 1 }

</bundles_post_ra>
